<compile_context>
chip_gen: v7x
topology: tpu7x:2x2x1
jax: 0.10.0
libtpu: 0.0.40
codegen_flags: <defaults>
</compile_context>

<pallas_src>
import functools

import jax
import jax.numpy as jnp
from jax.experimental import pallas as pl
from jax.experimental.pallas import tpu as pltpu

BN_EPS = 1e-5


# --------------------------------------------------------------------------
# Sizing helpers
# --------------------------------------------------------------------------
def _round_up(x: int, m: int) -> int:
    return ((x + m - 1) // m) * m


def _vmem_caps():
    """(per-grid-step working-set budget, scoped-VMEM limit) in bytes."""
    phys = 64 << 20                      # conservative default (v7x per-TC VMEM)
    try:
        info = pltpu.get_tpu_info()
        v = getattr(info, "vmem_capacity_bytes", None)
        if v:
            phys = int(v)
    except Exception:
        pass
    limit = min((phys * 3) // 4, 96 << 20)   # ~48 MiB on v7x, 96 MiB on v5e/v6e
    return limit // 2, limit


def _pick_tile_p(hw: int, cap_pixels: int) -> int:
    """Largest multiple of 128 dividing hw that is <= cap (else hw itself)."""
    if hw % 128 != 0 or hw <= 128:
        # TODO(synk): small / non-128-multiple maps (7x7, 14x14) would be better
        # served by a one-time XLA transpose to a lane-dense (C, N*HW) layout;
        # such shapes normally take the fused path below anyway.
        return hw
    cap = max(cap_pixels, 128)
    best, t = 128, 128
    while t <= min(hw, cap):
        if hw % t == 0:
            best = t
        t += 128
    return best


# --------------------------------------------------------------------------
# Kernels (tiles are lane-dense (C, P) slabs: channels x pixels)
# --------------------------------------------------------------------------
def _make_pass_a_kernel(C: int, midp: int):
    """gate_residual(block1) + accumulate per-image BN1 (sum, sumsq)."""

    def kernel(x_ref, ws_ref, w2_ref, vec_ref, y_ref, stats_ref):
        @pl.when(pl.program_id(1) == 0)
        def _():
            stats_ref[...] = jnp.zeros_like(stats_ref)

        xv = x_ref[...]                                   # (C, P), native dtype
        x = xv.astype(jnp.float32)
        b1 = vec_ref[0:midp, 0:1]
        b2 = vec_ref[0:C, 1:2]
        bg = vec_ref[0:C, 2:3]

        # One stacked matmul: rows [0:midp] -> hidden pre-act, [midp:] -> gate.
        z = jnp.dot(ws_ref[...], xv.astype(jnp.bfloat16),
                    preferred_element_type=jnp.float32)   # (midp + C, P)
        h = jnp.maximum(z[0:midp, :] + b1, 0.0)
        g = jax.nn.sigmoid(z[midp:, :] + bg)
        v = jnp.dot(w2_ref[...], h.astype(jnp.bfloat16),
                    preferred_element_type=jnp.float32) + b2
        y = x + g * v                                     # (C, P), f32

        y_ref[...] = y.astype(y_ref.dtype)                # bf16 store
        stats_ref[:, 0:1] += jnp.sum(y, axis=1, keepdims=True)
        stats_ref[:, 1:2] += jnp.sum(y * y, axis=1, keepdims=True)

    return kernel


def _make_pass_b_kernel(C: int, midp: int):
    """bn1(y1) -> gate_residual(block2) + accumulate per-image BN2 (sum, sumsq)."""

    def kernel(y1_ref, ws_ref, w2_ref, vec_ref, y2_ref, stats_ref):
        @pl.when(pl.program_id(1) == 0)
        def _():
            stats_ref[...] = jnp.zeros_like(stats_ref)

        b1 = vec_ref[0:midp, 0:1]
        b2 = vec_ref[0:C, 1:2]
        bg = vec_ref[0:C, 2:3]
        scale1 = vec_ref[0:C, 3:4]        # gamma1 * rsqrt(var1 + eps)
        shift1 = vec_ref[0:C, 4:5]        # beta1 - mu1 * scale1

        xn = y1_ref[...].astype(jnp.float32) * scale1 + shift1   # BN1 (folded)
        z = jnp.dot(ws_ref[...], xn.astype(jnp.bfloat16),
                    preferred_element_type=jnp.float32)
        h = jnp.maximum(z[0:midp, :] + b1, 0.0)
        g = jax.nn.sigmoid(z[midp:, :] + bg)
        v = jnp.dot(w2_ref[...], h.astype(jnp.bfloat16),
                    preferred_element_type=jnp.float32) + b2
        y2 = xn + g * v

        y2_ref[...] = y2.astype(y2_ref.dtype)
        stats_ref[:, 0:1] += jnp.sum(y2, axis=1, keepdims=True)
        stats_ref[:, 1:2] += jnp.sum(y2 * y2, axis=1, keepdims=True)

    return kernel


def _pass_c_kernel(y2_ref, x_ref, vec_ref, o_ref):
    """bn2(y2) + x  (final residual skip)."""
    scale2 = vec_ref[:, 0:1]
    shift2 = vec_ref[:, 1:2]
    o_ref[...] = (y2_ref[...].astype(jnp.float32) * scale2 + shift2
                  + x_ref[...].astype(jnp.float32)).astype(o_ref.dtype)


def _make_fused_kernel(C: int, midp0: int, midp1: int, count: float):
    """Whole forward in one kernel; the full (C, N*HW) slab is VMEM-resident."""
    inv_count = 1.0 / count

    def kernel(x_ref, ws1_ref, w12_ref, ws2_ref, w22_ref, vec_ref, o_ref):
        x = x_ref[...].astype(jnp.float32)                # (C, NP)

        def col(j, n):
            return vec_ref[0:n, j:j + 1]                  # (n, 1)

        def gate_residual(inp, ws_ref, w2_ref, b1, b2, bg, midp):
            z = jnp.dot(ws_ref[...], inp.astype(jnp.bfloat16),
                        preferred_element_type=jnp.float32)
            h = jnp.maximum(z[0:midp, :] + b1, 0.0)
            g = jax.nn.sigmoid(z[midp:, :] + bg)
            v = jnp.dot(w2_ref[...], h.astype(jnp.bfloat16),
                        preferred_element_type=jnp.float32) + b2
            return inp + g * v

        def bn(inp, gamma, beta):                         # exact two-pass BN
            mu = jnp.sum(inp, axis=1, keepdims=True) * inv_count
            var = jnp.sum(jnp.square(inp - mu), axis=1, keepdims=True) * inv_count
            return (inp - mu) * jax.lax.rsqrt(var + BN_EPS) * gamma + beta

        y = gate_residual(x, ws1_ref, w12_ref, col(0, midp0), col(1, C), col(2, C), midp0)
        y = bn(y, col(3, C), col(4, C))
        y = gate_residual(y, ws2_ref, w22_ref, col(5, midp1), col(6, C), col(7, C), midp1)
        y = bn(y, col(8, C), col(9, C))
        o_ref[...] = (y + x).astype(o_ref.dtype)

    return kernel


# --------------------------------------------------------------------------
# Parameter packing helpers
# --------------------------------------------------------------------------
def _pad_vec(v, n):
    return jnp.pad(v.astype(jnp.float32).reshape(-1), (0, n - int(v.shape[0])))


def _pack_cols(vecs):
    """Pack 1-D per-channel vectors as columns of one (Lmax, n_vec) f32 slab."""
    lmax = max(int(v.shape[0]) for v in vecs)
    cols = [_pad_vec(v, lmax) for v in vecs]
    return jnp.stack(cols, axis=1)


def _stack_weights(w1, wg, w2):
    """Pad mid to a multiple of 8, stack [w1; wg] so one matmul yields both."""
    mid, _ = w1.shape
    midp = _round_up(mid, 8)
    w1p = jnp.pad(w1, ((0, midp - mid), (0, 0)))
    w2p = jnp.pad(w2, ((0, 0), (0, midp - mid)))          # zero cols for padded h rows
    ws = jnp.concatenate([w1p, wg], axis=0).astype(jnp.bfloat16)   # (midp + C, C)
    return ws, w2p.astype(jnp.bfloat16), midp


def _bn_fold(stats, gamma, beta, count):
    """Per-image (sum, sumsq) partials -> per-channel BN (scale, shift)."""
    s = jnp.sum(stats, axis=0)                            # (C, 2)
    mu = s[:, 0] / count
    # TODO(synk): single-pass E[x^2]-E[x]^2 can lose precision when |mean| >> std;
    # a per-channel pre-shift / Welford merge would be more robust.
    var = s[:, 1] / count - mu * mu
    inv = jax.lax.rsqrt(jnp.maximum(var, 0.0) + BN_EPS)
    scale = gamma * inv
    shift = beta - mu * scale
    return scale, shift


# --------------------------------------------------------------------------
# Wrapper
# --------------------------------------------------------------------------
@functools.partial(jax.jit, static_argnames=("force_tiled",))
def dual_gate_bn(x_nchw, params, force_tiled=False):
    N, C, H, W = x_nchw.shape
    HW = H * W
    R = N * HW

    ws1, w12p, midp0 = _stack_weights(params["w11"], params["wg1"], params["w12"])
    ws2, w22p, midp1 = _stack_weights(params["w21"], params["wg2"], params["w22"])
    midp_max = max(midp0, midp1)

    budget, vmem_limit = _vmem_caps()
    # Generous f32 working-set estimate per pixel column (streams + intermediates).
    bytes_per_pixel = 4 * (2 * midp_max + 6 * C + 4)

    # ---- fused fast path: whole (C, N*HW) slab resident in VMEM -------------
    if (not force_tiled) and R * bytes_per_pixel <= budget:
        vec_f = _pack_cols([
            _pad_vec(params["b11"], midp0), params["b12"], params["bg1"],
            params["g1"], params["be1"],
            _pad_vec(params["b21"], midp1), params["b22"], params["bg2"],
            params["g2"], params["be2"]])
        # One-time XLA transpose to a lane-dense (C, N*HW) slab (small by premise).
        xt = jnp.transpose(x_nchw.reshape(N, C, HW), (1, 0, 2)).reshape(C, R)
        out2d = pl.pallas_call(
            _make_fused_kernel(C, midp0, midp1, float(R)),
            grid=(1,),
            in_specs=[pl.BlockSpec((C, R), lambda i: (0, 0)),
                      pl.BlockSpec(ws1.shape, lambda i: (0, 0)),
                      pl.BlockSpec(w12p.shape, lambda i: (0, 0)),
                      pl.BlockSpec(ws2.shape, lambda i: (0, 0)),
                      pl.BlockSpec(w22p.shape, lambda i: (0, 0)),
                      pl.BlockSpec(vec_f.shape, lambda i: (0, 0))],
            out_specs=pl.BlockSpec((C, R), lambda i: (0, 0)),
            out_shape=jax.ShapeDtypeStruct((C, R), x_nchw.dtype),
            compiler_params=pltpu.CompilerParams(
                dimension_semantics=("arbitrary",),
                vmem_limit_bytes=vmem_limit),
        )(xt, ws1, w12p, ws2, w22p, vec_f)
        return jnp.transpose(out2d.reshape(C, N, HW), (1, 0, 2)).reshape(N, C, H, W)

    # ---- tiled 3-pass path ---------------------------------------------------
    TILE_P = _pick_tile_p(HW, budget // bytes_per_pixel)
    grid = (N, HW // TILE_P)

    xf = x_nchw.reshape(N, C, HW)          # free reshape; native dtype in HBM

    act_spec = pl.BlockSpec((None, C, TILE_P), lambda n, p: (n, 0, p))
    stats_spec = pl.BlockSpec((None, C, 2), lambda n, p: (n, 0, 0))  # per-image acc

    def const_spec(a):                                    # DMA'd once, VMEM-resident
        return pl.BlockSpec(a.shape, lambda n, p: (0,) * a.ndim)

    y_slab = jax.ShapeDtypeStruct((N, C, HW), jnp.bfloat16)
    stats_slab = jax.ShapeDtypeStruct((N, C, 2), jnp.float32)
    gr_params = pltpu.CompilerParams(
        dimension_semantics=("parallel", "arbitrary"), vmem_limit_bytes=vmem_limit)

    def gr_cost(midp, in_b, out_b):
        return pl.CostEstimate(
            flops=int(R * (2 * C * (midp + C) + 2 * C * midp + 12 * C)),
            transcendentals=int(R * C),
            bytes_accessed=int(R * C * (in_b + out_b)))

    # pass A: gate_residual(block1), accumulate BN1 per-image stats
    vec_a = _pack_cols([_pad_vec(params["b11"], midp0), params["b12"], params["bg1"]])
    y1, stats1 = pl.pallas_call(
        _make_pass_a_kernel(C, midp0),
        grid=grid,
        in_specs=[act_spec, const_spec(ws1), const_spec(w12p), const_spec(vec_a)],
        out_specs=(act_spec, stats_spec),
        out_shape=(y_slab, stats_slab),
        compiler_params=gr_params,
        cost_estimate=gr_cost(midp0, x_nchw.dtype.itemsize, 2),
    )(xf, ws1, w12p, vec_a)

    scale1, shift1 = _bn_fold(stats1, params["g1"], params["be1"], float(R))

    # pass B: bn1 -> gate_residual(block2), accumulate BN2 per-image stats
    vec_b = _pack_cols([_pad_vec(params["b21"], midp1), params["b22"], params["bg2"],
                        scale1, shift1])
    y2, stats2 = pl.pallas_call(
        _make_pass_b_kernel(C, midp1),
        grid=grid,
        in_specs=[act_spec, const_spec(ws2), const_spec(w22p), const_spec(vec_b)],
        out_specs=(act_spec, stats_spec),
        out_shape=(y_slab, stats_slab),
        input_output_aliases={0: 0},        # y2 reuses y1's HBM slab
        compiler_params=gr_params,
        cost_estimate=gr_cost(midp1, 2, 2),
    )(y1, ws2, w22p, vec_b)

    scale2, shift2 = _bn_fold(stats2, params["g2"], params["be2"], float(R))

    # pass C: bn2 + final skip (embarrassingly parallel)
    vec_c = jnp.stack([scale2, shift2], axis=1)           # (C, 2)
    out = pl.pallas_call(
        _pass_c_kernel,
        grid=grid,
        in_specs=[act_spec, act_spec, const_spec(vec_c)],
        out_specs=act_spec,
        out_shape=jax.ShapeDtypeStruct((N, C, HW), x_nchw.dtype),
        compiler_params=pltpu.CompilerParams(
            dimension_semantics=("parallel", "parallel"),
            vmem_limit_bytes=vmem_limit),
        cost_estimate=pl.CostEstimate(flops=int(3 * R * C), transcendentals=0,
                                      bytes_accessed=int(R * C * 10)),
    )(y2, xf, vec_c)

    return out.reshape(N, C, H, W)


# --------------------------------------------------------------------------
# Params + pure-JAX reference
# --------------------------------------------------------------------------
def init_params(key, in_channels, mid0, out0, mid1, out1):
    assert out0 == in_channels and out1 == in_channels, (
        "GateResidual output must match in_channels (BatchNorm2D(in_channels) "
        "follows, and the final skip adds x).")
    ks = jax.random.split(key, 16)

    def w(k, cout, cin):   # 1x1 conv weight, (out, in) layout => y = W @ x
        return jax.random.normal(k, (cout, cin), jnp.float32) * 0.1

    def b(k, n):
        return jax.random.normal(k, (n,), jnp.float32) * 0.05

    return dict(
        w11=w(ks[0], mid0, in_channels), b11=b(ks[1], mid0),
        w12=w(ks[2], out0, mid0),        b12=b(ks[3], out0),
        wg1=w(ks[4], out0, in_channels), bg1=b(ks[5], out0),
        g1=1.0 + 0.1 * jax.random.normal(ks[6], (in_channels,), jnp.float32),
        be1=b(ks[7], in_channels),
        w21=w(ks[8], mid1, in_channels),  b21=b(ks[9], mid1),
        w22=w(ks[10], out1, mid1),        b22=b(ks[11], out1),
        wg2=w(ks[12], out1, in_channels), bg2=b(ks[13], out1),
        g2=1.0 + 0.1 * jax.random.normal(ks[14], (in_channels,), jnp.float32),
        be2=b(ks[15], in_channels),
    )


def _reference(x_nchw, params):
    """Pure-JAX f32 reference of the same forward semantics (two-pass BN)."""
    N, C, H, W = x_nchw.shape
    x = jnp.transpose(x_nchw, (0, 2, 3, 1)).reshape(-1, C).astype(jnp.float32)

    def gr(inp, w1, b1, w2, b2, wg, bg):
        h = jnp.maximum(inp @ w1.T + b1, 0.0)
        v = h @ w2.T + b2
        g = jax.nn.sigmoid(inp @ wg.T + bg)
        return inp + g * v

    def bn(inp, gamma, beta):
        mu = inp.mean(0, keepdims=True)
        var = ((inp - mu) ** 2).mean(0, keepdims=True)
        return (inp - mu) * jax.lax.rsqrt(var + BN_EPS) * gamma + beta

    p = params
    y = bn(gr(x, p["w11"], p["b11"], p["w12"], p["b12"], p["wg1"], p["bg1"]),
           p["g1"], p["be1"])
    y = bn(gr(y, p["w21"], p["b21"], p["w22"], p["b22"], p["wg2"], p["bg2"]),
           p["g2"], p["be2"])
    y = y + x
    return jnp.transpose(y.reshape(N, H, W, C), (0, 3, 1, 2))


if __name__ == "__main__":
    in_channels, mid0, out0, mid1, out1 = 8, 16, 8, 16, 8
    N, H, W = 2, 16, 16

    key = jax.random.PRNGKey(0)
    k_x, k_p = jax.random.split(key)
    x = jax.random.normal(k_x, (N, in_channels, H, W), jnp.float32)
    params = init_params(k_p, in_channels, mid0, out0, mid1, out1)

    ref = _reference(x, params)

    # Fused single-kernel path (whole activation slab resident in VMEM).
    out_fused = jax.block_until_ready(dual_gate_bn(x, params))
    # Tiled 3-pass path (forced here for coverage). bf16 inter-pass slabs /
    # bf16 MXU inputs => relaxed tolerance, as recommended by the perf review.
    out_tiled = jax.block_until_ready(dual_gate_bn(x, params, force_tiled=True))

    for o in (out_fused, out_tiled):
        assert o.shape == x.shape and o.dtype == x.dtype
    assert jnp.allclose(out_fused, ref, atol=2e-2, rtol=2e-2), "fused path mismatch"
    assert jnp.allclose(out_tiled, ref, atol=5e-2, rtol=5e-2), "tiled path mismatch"

    print("KERNEL_OK")
</pallas_src>

<mosaic_0001>
module attributes {stable_mosaic.version = 11 : i64} {
  func.func @kernel(%arg0: i32, %arg1: memref<8x512xf32, #tpu.memory_space<vmem>>, %arg2: memref<24x8xbf16, #tpu.memory_space<vmem>>, %arg3: memref<8x16xbf16, #tpu.memory_space<vmem>>, %arg4: memref<24x8xbf16, #tpu.memory_space<vmem>>, %arg5: memref<8x16xbf16, #tpu.memory_space<vmem>>, %arg6: memref<16x10xf32, #tpu.memory_space<vmem>>, %arg7: memref<8x512xf32, #tpu.memory_space<vmem>>) attributes {dimension_semantics = [#tpu.dimension_semantics<arbitrary>], iteration_bounds = array<i64: 1>, scalar_prefetch = 0 : i64, scratch_operands = 0 : i64, tpu.core_type = #tpu.core_type<tc>, window_params = [{pipeline_mode = #tpu.pipeline_mode<synchronous>, transform_indices = @transform_0, window_bounds = array<i64: 8, 512>}, {pipeline_mode = #tpu.pipeline_mode<synchronous>, transform_indices = @transform_1, window_bounds = array<i64: 24, 8>}, {pipeline_mode = #tpu.pipeline_mode<synchronous>, transform_indices = @transform_2, window_bounds = array<i64: 8, 16>}, {pipeline_mode = #tpu.pipeline_mode<synchronous>, transform_indices = @transform_3, window_bounds = array<i64: 24, 8>}, {pipeline_mode = #tpu.pipeline_mode<synchronous>, transform_indices = @transform_4, window_bounds = array<i64: 8, 16>}, {pipeline_mode = #tpu.pipeline_mode<synchronous>, transform_indices = @transform_5, window_bounds = array<i64: 16, 10>}, {pipeline_mode = #tpu.pipeline_mode<synchronous>, transform_indices = @transform_6, window_bounds = array<i64: 8, 512>}]} {
    %c0 = arith.constant 0 : index
    %c0_0 = arith.constant 0 : index
    %0 = vector.load %arg1[%c0, %c0_0] : memref<8x512xf32, #tpu.memory_space<vmem>>, vector<8x512xf32>
    %c0_1 = arith.constant 0 : index
    %c0_2 = arith.constant 0 : index
    %1 = vector.load %arg6[%c0_1, %c0_2] : memref<16x10xf32, #tpu.memory_space<vmem>>, vector<16x1xf32>
    %c0_3 = arith.constant 0 : index
    %c1 = arith.constant 1 : index
    %2 = vector.load %arg6[%c0_3, %c1] : memref<16x10xf32, #tpu.memory_space<vmem>>, vector<8x1xf32>
    %c0_4 = arith.constant 0 : index
    %c2 = arith.constant 2 : index
    %3 = vector.load %arg6[%c0_4, %c2] : memref<16x10xf32, #tpu.memory_space<vmem>>, vector<8x1xf32>
    %c0_5 = arith.constant 0 : index
    %c0_6 = arith.constant 0 : index
    %4 = vector.load %arg2[%c0_5, %c0_6] : memref<24x8xbf16, #tpu.memory_space<vmem>>, vector<24x8xbf16>
    %5 = arith.truncf %0 : vector<8x512xf32> to vector<8x512xbf16>
    %cst = arith.constant dense<0.000000e+00> : vector<24x512xf32>
    %6 = tpu.matmul %4, %5, %cst {dimension_numbers = #tpu.dot_dimension_numbers<[1], [0], [0], [1], [0, 0, 1, 1], [], []>} : vector<24x8xbf16>, vector<8x512xbf16>, vector<24x512xf32> -> vector<24x512xf32>
    %7 = vector.extract_strided_slice %6 {offsets = [0, 0], sizes = [16, 512], strides = [1, 1]} : vector<24x512xf32> to vector<16x512xf32>
    %8 = vector.broadcast %1 : vector<16x1xf32> to vector<16x512xf32>
    %9 = arith.addf %7, %8 : vector<16x512xf32>
    %cst_7 = arith.constant 0.000000e+00 : f32
    %10 = vector.broadcast %cst_7 : f32 to vector<16x512xf32>
    %11 = arith.maximumf %9, %10 : vector<16x512xf32>
    %12 = vector.extract_strided_slice %6 {offsets = [16, 0], sizes = [8, 512], strides = [1, 1]} : vector<24x512xf32> to vector<8x512xf32>
    %13 = vector.broadcast %3 : vector<8x1xf32> to vector<8x512xf32>
    %14 = arith.addf %12, %13 : vector<8x512xf32>
    %15 = arith.negf %14 : vector<8x512xf32>
    %16 = math.exp %15 : vector<8x512xf32>
    %cst_8 = arith.constant 1.000000e+00 : f32
    %17 = vector.broadcast %cst_8 : f32 to vector<8x512xf32>
    %18 = arith.addf %17, %16 : vector<8x512xf32>
    %19 = arith.divf %17, %18 : vector<8x512xf32>
    %c0_9 = arith.constant 0 : index
    %c0_10 = arith.constant 0 : index
    %20 = vector.load %arg3[%c0_9, %c0_10] : memref<8x16xbf16, #tpu.memory_space<vmem>>, vector<8x16xbf16>
    %21 = arith.truncf %11 : vector<16x512xf32> to vector<16x512xbf16>
    %cst_11 = arith.constant dense<0.000000e+00> : vector<8x512xf32>
    %22 = tpu.matmul %20, %21, %cst_11 {dimension_numbers = #tpu.dot_dimension_numbers<[1], [0], [0], [1], [0, 0, 1, 1], [], []>} : vector<8x16xbf16>, vector<16x512xbf16>, vector<8x512xf32> -> vector<8x512xf32>
    %23 = vector.broadcast %2 : vector<8x1xf32> to vector<8x512xf32>
    %24 = arith.addf %22, %23 : vector<8x512xf32>
    %25 = arith.mulf %19, %24 : vector<8x512xf32>
    %26 = arith.addf %0, %25 : vector<8x512xf32>
    %c0_12 = arith.constant 0 : index
    %c3 = arith.constant 3 : index
    %27 = vector.load %arg6[%c0_12, %c3] : memref<16x10xf32, #tpu.memory_space<vmem>>, vector<8x1xf32>
    %c0_13 = arith.constant 0 : index
    %c4 = arith.constant 4 : index
    %28 = vector.load %arg6[%c0_13, %c4] : memref<16x10xf32, #tpu.memory_space<vmem>>, vector<8x1xf32>
    %cst_14 = arith.constant dense<0.000000e+00> : vector<8xf32>
    %29 = vector.multi_reduction <add>, %26, %cst_14 [1] : vector<8x512xf32> to vector<8xf32>
    %30 = vector.shape_cast %29 : vector<8xf32> to vector<8x1xf32>
    %cst_15 = arith.constant 0.001953125 : f32
    %31 = vector.broadcast %cst_15 : f32 to vector<8x1xf32>
    %32 = arith.mulf %30, %31 : vector<8x1xf32>
    %33 = vector.broadcast %32 : vector<8x1xf32> to vector<8x512xf32>
    %34 = arith.subf %26, %33 : vector<8x512xf32>
    %35 = arith.mulf %34, %34 : vector<8x512xf32>
    %cst_16 = arith.constant dense<0.000000e+00> : vector<8xf32>
    %36 = vector.multi_reduction <add>, %35, %cst_16 [1] : vector<8x512xf32> to vector<8xf32>
    %37 = vector.shape_cast %36 : vector<8xf32> to vector<8x1xf32>
    %cst_17 = arith.constant 0.001953125 : f32
    %38 = vector.broadcast %cst_17 : f32 to vector<8x1xf32>
    %39 = arith.mulf %37, %38 : vector<8x1xf32>
    %40 = vector.broadcast %32 : vector<8x1xf32> to vector<8x512xf32>
    %41 = arith.subf %26, %40 : vector<8x512xf32>
    %cst_18 = arith.constant 9.99999974E-6 : f32
    %42 = vector.broadcast %cst_18 : f32 to vector<8x1xf32>
    %43 = arith.addf %39, %42 : vector<8x1xf32>
    %44 = math.rsqrt %43 : vector<8x1xf32>
    %45 = vector.broadcast %44 : vector<8x1xf32> to vector<8x512xf32>
    %46 = arith.mulf %41, %45 : vector<8x512xf32>
    %47 = vector.broadcast %27 : vector<8x1xf32> to vector<8x512xf32>
    %48 = arith.mulf %46, %47 : vector<8x512xf32>
    %49 = vector.broadcast %28 : vector<8x1xf32> to vector<8x512xf32>
    %50 = arith.addf %48, %49 : vector<8x512xf32>
    %c0_19 = arith.constant 0 : index
    %c5 = arith.constant 5 : index
    %51 = vector.load %arg6[%c0_19, %c5] : memref<16x10xf32, #tpu.memory_space<vmem>>, vector<16x1xf32>
    %c0_20 = arith.constant 0 : index
    %c6 = arith.constant 6 : index
    %52 = vector.load %arg6[%c0_20, %c6] : memref<16x10xf32, #tpu.memory_space<vmem>>, vector<8x1xf32>
    %c0_21 = arith.constant 0 : index
    %c7 = arith.constant 7 : index
    %53 = vector.load %arg6[%c0_21, %c7] : memref<16x10xf32, #tpu.memory_space<vmem>>, vector<8x1xf32>
    %c0_22 = arith.constant 0 : index
    %c0_23 = arith.constant 0 : index
    %54 = vector.load %arg4[%c0_22, %c0_23] : memref<24x8xbf16, #tpu.memory_space<vmem>>, vector<24x8xbf16>
    %55 = arith.truncf %50 : vector<8x512xf32> to vector<8x512xbf16>
    %cst_24 = arith.constant dense<0.000000e+00> : vector<24x512xf32>
    %56 = tpu.matmul %54, %55, %cst_24 {dimension_numbers = #tpu.dot_dimension_numbers<[1], [0], [0], [1], [0, 0, 1, 1], [], []>} : vector<24x8xbf16>, vector<8x512xbf16>, vector<24x512xf32> -> vector<24x512xf32>
    %57 = vector.extract_strided_slice %56 {offsets = [0, 0], sizes = [16, 512], strides = [1, 1]} : vector<24x512xf32> to vector<16x512xf32>
    %58 = vector.broadcast %51 : vector<16x1xf32> to vector<16x512xf32>
    %59 = arith.addf %57, %58 : vector<16x512xf32>
    %cst_25 = arith.constant 0.000000e+00 : f32
    %60 = vector.broadcast %cst_25 : f32 to vector<16x512xf32>
    %61 = arith.maximumf %59, %60 : vector<16x512xf32>
    %62 = vector.extract_strided_slice %56 {offsets = [16, 0], sizes = [8, 512], strides = [1, 1]} : vector<24x512xf32> to vector<8x512xf32>
    %63 = vector.broadcast %53 : vector<8x1xf32> to vector<8x512xf32>
    %64 = arith.addf %62, %63 : vector<8x512xf32>
    %65 = arith.negf %64 : vector<8x512xf32>
    %66 = math.exp %65 : vector<8x512xf32>
    %cst_26 = arith.constant 1.000000e+00 : f32
    %67 = vector.broadcast %cst_26 : f32 to vector<8x512xf32>
    %68 = arith.addf %67, %66 : vector<8x512xf32>
    %69 = arith.divf %67, %68 : vector<8x512xf32>
    %c0_27 = arith.constant 0 : index
    %c0_28 = arith.constant 0 : index
    %70 = vector.load %arg5[%c0_27, %c0_28] : memref<8x16xbf16, #tpu.memory_space<vmem>>, vector<8x16xbf16>
    %71 = arith.truncf %61 : vector<16x512xf32> to vector<16x512xbf16>
    %cst_29 = arith.constant dense<0.000000e+00> : vector<8x512xf32>
    %72 = tpu.matmul %70, %71, %cst_29 {dimension_numbers = #tpu.dot_dimension_numbers<[1], [0], [0], [1], [0, 0, 1, 1], [], []>} : vector<8x16xbf16>, vector<16x512xbf16>, vector<8x512xf32> -> vector<8x512xf32>
    %73 = vector.broadcast %52 : vector<8x1xf32> to vector<8x512xf32>
    %74 = arith.addf %72, %73 : vector<8x512xf32>
    %75 = arith.mulf %69, %74 : vector<8x512xf32>
    %76 = arith.addf %50, %75 : vector<8x512xf32>
    %c0_30 = arith.constant 0 : index
    %c8 = arith.constant 8 : index
    %77 = vector.load %arg6[%c0_30, %c8] : memref<16x10xf32, #tpu.memory_space<vmem>>, vector<8x1xf32>
    %c0_31 = arith.constant 0 : index
    %c9 = arith.constant 9 : index
    %78 = vector.load %arg6[%c0_31, %c9] : memref<16x10xf32, #tpu.memory_space<vmem>>, vector<8x1xf32>
    %cst_32 = arith.constant dense<0.000000e+00> : vector<8xf32>
    %79 = vector.multi_reduction <add>, %76, %cst_32 [1] : vector<8x512xf32> to vector<8xf32>
    %80 = vector.shape_cast %79 : vector<8xf32> to vector<8x1xf32>
    %cst_33 = arith.constant 0.001953125 : f32
    %81 = vector.broadcast %cst_33 : f32 to vector<8x1xf32>
    %82 = arith.mulf %80, %81 : vector<8x1xf32>
    %83 = vector.broadcast %82 : vector<8x1xf32> to vector<8x512xf32>
    %84 = arith.subf %76, %83 : vector<8x512xf32>
    %85 = arith.mulf %84, %84 : vector<8x512xf32>
    %cst_34 = arith.constant dense<0.000000e+00> : vector<8xf32>
    %86 = vector.multi_reduction <add>, %85, %cst_34 [1] : vector<8x512xf32> to vector<8xf32>
    %87 = vector.shape_cast %86 : vector<8xf32> to vector<8x1xf32>
    %cst_35 = arith.constant 0.001953125 : f32
    %88 = vector.broadcast %cst_35 : f32 to vector<8x1xf32>
    %89 = arith.mulf %87, %88 : vector<8x1xf32>
    %90 = vector.broadcast %82 : vector<8x1xf32> to vector<8x512xf32>
    %91 = arith.subf %76, %90 : vector<8x512xf32>
    %cst_36 = arith.constant 9.99999974E-6 : f32
    %92 = vector.broadcast %cst_36 : f32 to vector<8x1xf32>
    %93 = arith.addf %89, %92 : vector<8x1xf32>
    %94 = math.rsqrt %93 : vector<8x1xf32>
    %95 = vector.broadcast %94 : vector<8x1xf32> to vector<8x512xf32>
    %96 = arith.mulf %91, %95 : vector<8x512xf32>
    %97 = vector.broadcast %77 : vector<8x1xf32> to vector<8x512xf32>
    %98 = arith.mulf %96, %97 : vector<8x512xf32>
    %99 = vector.broadcast %78 : vector<8x1xf32> to vector<8x512xf32>
    %100 = arith.addf %98, %99 : vector<8x512xf32>
    %101 = arith.addf %100, %0 : vector<8x512xf32>
    %c0_37 = arith.constant 0 : index
    %c0_38 = arith.constant 0 : index
    %102 = vector.load %arg7[%c0_37, %c0_38] : memref<8x512xf32, #tpu.memory_space<vmem>>, vector<8x512xf32>
    tpu.vector_store %arg7[%c0_37, %c0_38], %101 {strides = array<i32>} : memref<8x512xf32, #tpu.memory_space<vmem>>, vector<8x512xf32>,
    return
  }
  func.func @transform_0(%arg0: i32) -> (i32, i32) {
    %c0_i32 = arith.constant 0 : i32
    %c0_i32_0 = arith.constant 0 : i32
    %c0_i32_1 = arith.constant 0 : i32
    return %c0_i32, %c0_i32_0 : i32, i32
  }
  func.func @transform_1(%arg0: i32) -> (i32, i32) {
    %c0_i32 = arith.constant 0 : i32
    %c0_i32_0 = arith.constant 0 : i32
    %c0_i32_1 = arith.constant 0 : i32
    return %c0_i32, %c0_i32_0 : i32, i32
  }
  func.func @transform_2(%arg0: i32) -> (i32, i32) {
    %c0_i32 = arith.constant 0 : i32
    %c0_i32_0 = arith.constant 0 : i32
    %c0_i32_1 = arith.constant 0 : i32
    return %c0_i32, %c0_i32_0 : i32, i32
  }
  func.func @transform_3(%arg0: i32) -> (i32, i32) {
    %c0_i32 = arith.constant 0 : i32
    %c0_i32_0 = arith.constant 0 : i32
    %c0_i32_1 = arith.constant 0 : i32
    return %c0_i32, %c0_i32_0 : i32, i32
  }
  func.func @transform_4(%arg0: i32) -> (i32, i32) {
    %c0_i32 = arith.constant 0 : i32
    %c0_i32_0 = arith.constant 0 : i32
    %c0_i32_1 = arith.constant 0 : i32
    return %c0_i32, %c0_i32_0 : i32, i32
  }
  func.func @transform_5(%arg0: i32) -> (i32, i32) {
    %c0_i32 = arith.constant 0 : i32
    %c0_i32_0 = arith.constant 0 : i32
    %c0_i32_1 = arith.constant 0 : i32
    return %c0_i32, %c0_i32_0 : i32, i32
  }
  func.func @transform_6(%arg0: i32) -> (i32, i32) {
    %c0_i32 = arith.constant 0 : i32
    %c0_i32_0 = arith.constant 0 : i32
    %c0_i32_1 = arith.constant 0 : i32
    return %c0_i32, %c0_i32_0 : i32, i32
  }
}

</mosaic_0001>

<bundles_post_ra>
// kernel: dual_gate_bn.1
= control target key start
LH: loop header
LB: loop body
LE: loop exit
PB: predicated region body
PF: predicated region fallthrough
CT: control target
= control target key end

     0   :  { %vm52_vm0 = vcmask 1043456   ;;  %v805_v3 = vmov 0   ;;  %vm45_vm1 = vcmask 64512   ;;  %v806_v15 = vmov 2   ;;  %s991_s0 = inlined_call_operand.vmem [shape: f32[8,512], index: 0, kind: input, shape index: {}]   ;;  %s992_s5 = inlined_call_operand.vmem [shape: f32[16,10], index: 5, kind: input, shape index: {}]   ;;  %s993_s1 = inlined_call_operand.vmem [shape: bf16[24,8], index: 1, kind: input, shape index: {}]   ;;  %s994_s2 = inlined_call_operand.vmem [shape: bf16[8,16], index: 2, kind: input, shape index: {}]   ;;  %s995_s3 = inlined_call_operand.vmem [shape: bf16[24,8], index: 3, kind: input, shape index: {}]   ;;  %s996_s4 = inlined_call_operand.vmem [shape: bf16[8,16], index: 4, kind: input, shape index: {}]   ;;  %s997_s6 = inlined_call_operand.vmem [shape: f32[8,512], index: 6, kind: output, shape index: {}]  }
   0x1   :  { %v853_v0 = vld [vmem:[%s991_s0 + $0x8] sm:$0xff]  ;;  %v858_v1 = vld [vmem:[%s991_s0 + $0x18] sm:$0xff]  ;;  %v863_v2 = vld [vmem:[%s991_s0] sm:$0xff]  ;;  %97 = vmatprep.mubr.bf16.mxu0 %v805_v3  ;;  %148 = vmatprep.mubr.bf16.mxu1 %v805_v3  ;;  %v807_v16 = vmov 1   ;;  %vm234_vm2 = vcmask 130048  }
   0x2   :  { %v34_v4 = vpack.c.bf16 %v853_v0, %v853_v0  ;;  %v36_v5 = vpack.c.bf16 %v858_v1, %v858_v1  ;;  %v33_v6 = vpack.c.bf16 %v863_v2, %v863_v2  ;;  %v876_v7 = vld [vmem:[%s991_s0 + $0x10] sm:$0xff]  ;;  %755 = vset.pattern.permute.xlu0 %v805_v3  ;;  %v884_v9 = vld [vmem:[%s992_s5] sm:$0xff]  ;;  %v897_v13 = vld [vmem:[%s992_s5 + $0x8] sm:$0xff]  ;;  %756 = vset.pattern.permute.xlu1 %v806_v15 }
   0x3   :  { %v35_v8 = vpack.c.bf16 %v876_v7, %v876_v7  ;;  %v765_v11 = vld [vmem:[%s993_s1] sm:$0xff]   ;;  %169 = vperm.xlu0 %755, %v884_v9   ;;  %v766_v14 = vld [vmem:[%s993_s1 + $0x8] ss:$0 sps:$4 sm:$0xff]   ;;  %194 = vperm.xlu1 %756, %v884_v9  }
   0x4   :  { %719 = vmatprep.subr.msk.bf16.mxu0 %vm52_vm0, %v34_v4  ;;  %722 = vmatprep.subr.msk.bf16.mxu1 %vm52_vm0, %v36_v5  ;;  %v54_v10 = vsel %vm52_vm0, %v33_v6, 0  ;;  %v225_v52 = vld [vmem:[%s994_s2] sm:$0xf] }
   0x5   :  { %66 = vmatpush1.bf16.msra.mxu0 %v54_v10  ;;  %v60_v12 = vsel %vm52_vm0, %v35_v8, 0 }
   0x6   :  { %117 = vmatpush1.bf16.msra.mxu1 %v60_v12 }
   0x7   :  { %174 = vperm.xlu0 %755, %v897_v13   ;;  %757 = vset.pattern.permute.xlu1 %v807_v16 }
   0x8   :  { %720 = vmatmul.mubr.msk.bf16.vlgmr.msra.gmra.mrb[0].mxu0 %vm45_vm1, %v765_v11  ;;  %231 = vperm.xlu1 %757, %v884_v9  }
   0x9   :  { %723 = vmatmul.mubr.msk.bf16.vlgmr.msra.gmra.mrb[0].mxu1 %vm45_vm1, %v765_v11  ;;  %107 = vmatprep.mubr.bf16.mxu0 %v805_v3 }
   0xa   :  { %158 = vmatprep.mubr.bf16.mxu1 %v805_v3 }
  0x10   :  { %721 = vmatmul.mubr.msk.bf16.gmra.mrb[4].mxu0 %vm45_vm1, %v766_v14 }
  0x11   :  { %724 = vmatmul.mubr.msk.bf16.gmra.mrb[4].mxu1 %vm45_vm1, %v766_v14  ;;  %270 = vmatprep.mubr.bf16.mxu0 %v805_v3 }
  0x12   :  { %311 = vmatprep.mubr.bf16.mxu1 %v805_v3 }
  0x82   :  { %v170_v17 = vpop.permute.xlu0 %169  ;;  %v195_v56 = vpop.permute.xlu1 %194 }
  0x86   :  { %v175_v18 = vpop.permute.xlu0 %174 }
  0x87   :  { %v232_v16 = vpop.permute.xlu1 %231 }
  0xdb   :  { %v99_v19 = vpop.f32.mrb[0].mxu0 }
  0xdc   :  { %v177_v20 = vadd.f32 %v170_v17, %v99_v19  ;;  %v150_v21 = vpop.f32.mrb[0].mxu1  ;;  %v101_v22 = vpop.f32.mrb[1].mxu0 }
  0xdd   :  { %v179_v23 = vadd.f32 %v170_v17, %v150_v21  ;;  %v178_v24 = vadd.f32 %v170_v17, %v101_v22  ;;  %v152_v25 = vpop.f32.mrb[1].mxu1  ;;  %v103_v26 = vpop.f32.mrb[2].mxu0 }
  0xde   :  { %v180_v27 = vadd.f32 %v170_v17, %v152_v25  ;;  %v181_v28 = vadd.f32 %v175_v18, %v103_v26  ;;  %v154_v29 = vpop.f32.mrb[2].mxu1  ;;  %v105_v30 = vpop.f32.mrb[3].mxu0  ;;  %v185_v34 = vmax.f32 %v177_v20, 0.0 }
  0xdf   :  { %v183_v31 = vadd.f32 %v175_v18, %v154_v29  ;;  %v182_v32 = vadd.f32 %v175_v18, %v105_v30  ;;  %v156_v33 = vpop.f32.mrb[3].mxu1  ;;  %v187_v37 = vmax.f32 %v179_v23, 0.0  ;;  %v186_v38 = vmax.f32 %v178_v24, 0.0 }
  0xe0   :  { %v189_v35 = vmax.f32 %v181_v28, 0.0  ;;  %v184_v36 = vadd.f32 %v175_v18, %v156_v33  ;;  %v188_v41 = vmax.f32 %v180_v27, 0.0 }
  0xe1   :  { %v191_v39 = vmax.f32 %v183_v31, 0.0  ;;  %v190_v40 = vmax.f32 %v182_v32, 0.0 }
  0xe2   :  { %v226_v42 = vpack.c.bf16 %v189_v35, %v185_v34  ;;  %v192_v43 = vmax.f32 %v184_v36, 0.0 }
  0xe3   :  { %v228_v44 = vpack.c.bf16 %v191_v39, %v187_v37  ;;  %v227_v45 = vpack.c.bf16 %v190_v40, %v186_v38  ;;  %v109_v46 = vpop.f32.mrb[4].mxu0 }
  0xe4   :  { %v229_v47 = vpack.c.bf16 %v192_v43, %v188_v41  ;;  %v111_v48 = vpop.f32.mrb[5].mxu0  ;;  %v160_v49 = vpop.f32.mrb[4].mxu1  ;;  %v197_v57 = vadd.f32 %v195_v56, %v109_v46 }
  0xe5   :  { %238 = vmatprep.subr.bf16.mxu0 %v227_v45  ;;  %v113_v50 = vpop.f32.mrb[6].mxu0  ;;  %v162_v51 = vpop.f32.mrb[5].mxu1  ;;  %v198_v58 = vadd.f32 %v195_v56, %v111_v48  ;;  %v199_v59 = vadd.f32 %v195_v56, %v160_v49  ;;  %v809_v45 = vmov 4  }
  0xe6   :  { %279 = vmatprep.subr.bf16.mxu1 %v229_v47  ;;  %239 = vmatpush1.bf16.msra.mxu0 %v226_v42  ;;  %v114_v53 = vpop.f32.mrb[7].mxu0  ;;  %v164_v54 = vpop.f32.mrb[6].mxu1  ;;  %v200_v60 = vadd.f32 %v195_v56, %v162_v51  ;;  %v725_v61 = vmul.f32 -1.442695, %v197_v57 }
  0xe7   :  { %280 = vmatpush1.bf16.msra.mxu1 %v228_v44  ;;  %v165_v55 = vpop.f32.mrb[7].mxu1  ;;  %v726_v62 = vmul.f32 -1.442695, %v198_v58  ;;  %v727_v63 = vmul.f32 -1.442695, %v199_v59  ;;  %v808_v44 = vmov 3   ;;  %759 = vset.pattern.permute.xlu1 %v809_v45 }
  0xe8   :  { %v728_v4 = vmul.f32 -1.442695, %v200_v60  ;;  %769 = vpow2.f32 %v725_v61  ;;  %758 = vset.pattern.permute.xlu0 %v808_v44  ;;  %v810_v59 = vmov 5  }
  0xe9   :  { %729 = vmatmul.mubr.msk.bf16.vlgmr.msra.gmra.mrb[8].mxu0 %vm234_vm2, %v225_v52  ;;  %771 = vpow2.f32 %v726_v62 }
  0xea   :  { %730 = vmatmul.mubr.msk.bf16.vlgmr.msra.gmra.mrb[8].mxu1 %vm234_vm2, %v225_v52  ;;  %435 = vmatprep.mubr.bf16.mxu0 %v805_v3  ;;  %773 = vpow2.f32 %v727_v63 }
  0xeb   :  { %486 = vmatprep.mubr.bf16.mxu1 %v805_v3  ;;  %775 = vpow2.f32 %v728_v4 }
  0xf2   :  { %v770_v5 = vpop.eup %769 }
  0xf3   :  { %v772_v6 = vpop.eup %771  ;;  %v213_v11 = vadd.f32 1.0, %v770_v5 }
  0xf4   :  { %v774_v8 = vpop.eup %773  ;;  %v214_v12 = vadd.f32 1.0, %v772_v6 }
  0xf5   :  { %v776_v10 = vpop.eup %775  ;;  %v215_v14 = vadd.f32 1.0, %v774_v8  ;;  %777 = vrcp.f32 %v213_v11 }
  0xf6   :  { %v216_v15 = vadd.f32 1.0, %v776_v10  ;;  %779 = vrcp.f32 %v214_v12 }
  0xf7   :  { %781 = vrcp.f32 %v215_v14 }
  0xf8   :  { %783 = vrcp.f32 %v216_v15 }
  0xff   :  { %v778_v17 = vpop.eup %777 }
 0x100   :  { %v780_v18 = vpop.eup %779 }
 0x101   :  { %v782_v20 = vpop.eup %781 }
 0x102   :  { %v784_v24 = vpop.eup %783 }
 0x1bc   :  { %v272_v19 = vpop.f32.mrb[8].mxu0 }
 0x1bd   :  { %v273_v21 = vadd.f32 %v272_v19, %v232_v16  ;;  %v313_v22 = vpop.f32.mrb[8].mxu1  ;;  %v274_v23 = vpop.f32.mrb[9].mxu0 }
 0x1be   :  { %v314_v25 = vadd.f32 %v313_v22, %v232_v16  ;;  %v275_v26 = vadd.f32 %v274_v23, %v232_v16  ;;  %v315_v27 = vpop.f32.mrb[9].mxu1  ;;  %v276_v28 = vpop.f32.mrb[10].mxu0 }
 0x1bf   :  { %v320_v29 = vmul.f32 %v778_v17, %v273_v21  ;;  %v316_v30 = vadd.f32 %v315_v27, %v232_v16  ;;  %v317_v31 = vpop.f32.mrb[10].mxu1  ;;  %v277_v32 = vpop.f32.mrb[11].mxu0  ;;  %v768_v27 = vld [vmem:[%s995_s3 + $0x8] ss:$0 sps:$4 sm:$0xff]   ;;  %v811_v28 = vmov 7  }
 0x1c0   :  { %v322_v33 = vmul.f32 %v782_v20, %v314_v25  ;;  %v321_v34 = vmul.f32 %v780_v18, %v275_v26  ;;  %v318_v35 = vpop.f32.mrb[11].mxu1  ;;  %v767_v26 = vld [vmem:[%s995_s3] sm:$0xff]  }
 0x1c1   :  { %v324_v36 = vadd.f32 %v320_v29, %v863_v2  ;;  %v323_v37 = vmul.f32 %v784_v24, %v316_v30  ;;  %v812_v29 = vmov 6  }
 0x1c2   :  { %v325_v38 = vadd.f32 %v321_v34, %v853_v0  ;;  %v326_v39 = vadd.f32 %v322_v33, %v876_v7 }
 0x1c3   :  { %v327_v41 = vadd.f32 %v323_v37, %v858_v1 }
 0x1c4   :  { %v328_v40 = vadd.f32 %v325_v38, %v324_v36 }
 0x1c6   :  { %v329_v42 = vadd.f32 %v328_v40, %v326_v39 }
 0x1c8   :  { %v330_v43 = vadd.f32 %v329_v42, %v327_v41 }
 0x1ca   :  { %331 = vadd.xlane.f32.xlu0 %v330_v43 }
 0x1e0   :  { %355 = vperm.xlu0 %758, %v884_v9  }
 0x257   :  { %v332_v46 = vpop.xlane.xlu0 %331 }
 0x258   :  { %v333_v47 = vmul.f32 0.001953125, %v332_v46 }
 0x25a   :  { %v334_v48 = vsub.f32 %v324_v36, %v333_v47  ;;  %v335_v49 = vsub.f32 %v325_v38, %v333_v47  ;;  %v336_v50 = vsub.f32 %v326_v39, %v333_v47  ;;  %v337_v51 = vsub.f32 %v327_v41, %v333_v47 }
 0x25c   :  { %v338_v52 = vmul.f32 %v334_v48, %v334_v48  ;;  %v339_v53 = vmul.f32 %v335_v49, %v335_v49  ;;  %v340_v54 = vmul.f32 %v336_v50, %v336_v50  ;;  %v341_v56 = vmul.f32 %v337_v51, %v337_v51 }
 0x25e   :  { %v342_v55 = vadd.f32 %v339_v53, %v338_v52 }
 0x25f   :  { %v356_v4 = vpop.permute.xlu0 %355 }
 0x260   :  { %v343_v57 = vadd.f32 %v342_v55, %v340_v54 }
 0x262   :  { %v344_v58 = vadd.f32 %v343_v57, %v341_v56 }
 0x264   :  { %345 = vadd.xlane.f32.xlu1 %v344_v58 }
 0x275   :  { %363 = vperm.xlu1 %759, %v884_v9  }
 0x279   :  { %760 = vset.pattern.permute.xlu1 %v810_v59 }
 0x27a   :  { %506 = vperm.xlu1 %760, %v884_v9  }
 0x27e   :  { %510 = vperm.xlu1 %760, %v897_v13  }
 0x282   :  { %761 = vset.pattern.permute.xlu1 %v811_v28 }
 0x283   :  { %530 = vperm.xlu1 %761, %v884_v9  }
 0x287   :  { %762 = vset.pattern.permute.xlu1 %v812_v29 }
 0x288   :  { %567 = vperm.xlu1 %762, %v884_v9  }
 0x2f1   :  { %v346_v60 = vpop.xlane.xlu1 %345 }
 0x2f2   :  { %v347_v61 = vmul.f32 0.001953125, %v346_v60 }
 0x2f4   :  { %v348_v62 = vadd.f32 1e-05, %v347_v61 }
 0x2f5   :  { %v364_v11 = vpop.permute.xlu1 %363 }
 0x2f6   :  { %785 = vrsqrt.f32 %v348_v62 }
 0x2f9   :  { %v507_v30 = vpop.permute.xlu1 %506 }
 0x2fd   :  { %v511_v31 = vpop.permute.xlu1 %510 }
 0x300   :  { %v786_v63 = vpop.eup %785 }
 0x301   :  { %v350_v5 = vmul.f32 %v786_v63, %v334_v48  ;;  %v351_v6 = vmul.f32 %v786_v63, %v335_v49  ;;  %v352_v8 = vmul.f32 %v786_v63, %v336_v50  ;;  %v353_v10 = vmul.f32 %v786_v63, %v337_v51 }
 0x303   :  { %v358_v12 = vmul.f32 %v356_v4, %v350_v5  ;;  %v359_v14 = vmul.f32 %v356_v4, %v351_v6  ;;  %v360_v15 = vmul.f32 %v356_v4, %v352_v8  ;;  %v361_v16 = vmul.f32 %v356_v4, %v353_v10  ;;  %v561_v5 = vld [vmem:[%s996_s4] sm:$0xf]  ;;  %v531_v10 = vpop.permute.xlu1 %530 }
 0x305   :  { %v928_v17 = vadd.f32 %v364_v11, %v358_v12  ;;  %v930_v18 = vadd.f32 %v364_v11, %v359_v14  ;;  %v932_v13 = vadd.f32 %v364_v11, %v360_v15  ;;  %v934_v19 = vadd.f32 %v364_v11, %v361_v16 }
 0x307   :  { %v374_v20 = vpack.c.bf16 %v930_v18, %v930_v18  ;;  %v376_v21 = vpack.c.bf16 %v934_v19, %v934_v19  ;;  %v373_v22 = vpack.c.bf16 %v928_v17, %v928_v17  ;;  %v375_v23 = vpack.c.bf16 %v932_v13, %v932_v13 }
 0x309   :  { %733 = vmatprep.subr.msk.bf16.mxu0 %vm52_vm0, %v374_v20  ;;  %736 = vmatprep.subr.msk.bf16.mxu1 %vm52_vm0, %v376_v21  ;;  %v392_v24 = vsel %vm52_vm0, %v373_v22, 0  ;;  %v398_v25 = vsel %vm52_vm0, %v375_v23, 0 }
 0x30a   :  { %404 = vmatpush1.bf16.msra.mxu0 %v392_v24  ;;  %455 = vmatpush1.bf16.msra.mxu1 %v398_v25 }
 0x30d   :  { %734 = vmatmul.mubr.msk.bf16.vlgmr.msra.gmra.mrb[12].mxu0 %vm45_vm1, %v767_v26  ;;  %737 = vmatmul.mubr.msk.bf16.vlgmr.msra.gmra.mrb[12].mxu1 %vm45_vm1, %v767_v26 }
 0x30e   :  { %445 = vmatprep.mubr.bf16.mxu0 %v805_v3  ;;  %496 = vmatprep.mubr.bf16.mxu1 %v805_v3 }
 0x315   :  { %735 = vmatmul.mubr.msk.bf16.gmra.mrb[16].mxu0 %vm45_vm1, %v768_v27  ;;  %738 = vmatmul.mubr.msk.bf16.gmra.mrb[16].mxu1 %vm45_vm1, %v768_v27 }
 0x316   :  { %605 = vmatprep.mubr.bf16.mxu0 %v805_v3  ;;  %646 = vmatprep.mubr.bf16.mxu1 %v805_v3 }
 0x3e0   :  { %v437_v32 = vpop.f32.mrb[12].mxu0  ;;  %v488_v33 = vpop.f32.mrb[12].mxu1 }
 0x3e1   :  { %v513_v34 = vadd.f32 %v507_v30, %v437_v32  ;;  %v515_v35 = vadd.f32 %v507_v30, %v488_v33  ;;  %v439_v36 = vpop.f32.mrb[13].mxu0  ;;  %v490_v37 = vpop.f32.mrb[13].mxu1 }
 0x3e2   :  { %v514_v38 = vadd.f32 %v507_v30, %v439_v36  ;;  %v516_v39 = vadd.f32 %v507_v30, %v490_v37  ;;  %v441_v40 = vpop.f32.mrb[14].mxu0  ;;  %v492_v3 = vpop.f32.mrb[14].mxu1 }
 0x3e3   :  { %v517_v41 = vadd.f32 %v511_v31, %v441_v40  ;;  %v519_v42 = vadd.f32 %v511_v31, %v492_v3  ;;  %v443_v43 = vpop.f32.mrb[15].mxu0  ;;  %v494_v44 = vpop.f32.mrb[15].mxu1  ;;  %v521_v47 = vmax.f32 %v513_v34, 0.0  ;;  %v523_v48 = vmax.f32 %v515_v35, 0.0 }
 0x3e4   :  { %v518_v45 = vadd.f32 %v511_v31, %v443_v43  ;;  %v520_v46 = vadd.f32 %v511_v31, %v494_v44  ;;  %v522_v51 = vmax.f32 %v514_v38, 0.0  ;;  %v524_v52 = vmax.f32 %v516_v39, 0.0  ;;  %v568_v32 = vpop.permute.xlu1 %567 }
 0x3e5   :  { %v525_v49 = vmax.f32 %v517_v41, 0.0  ;;  %v527_v50 = vmax.f32 %v519_v42, 0.0 }
 0x3e6   :  { %v526_v53 = vmax.f32 %v518_v45, 0.0  ;;  %v528_v54 = vmax.f32 %v520_v46, 0.0 }
 0x3e7   :  { %v562_v55 = vpack.c.bf16 %v525_v49, %v521_v47  ;;  %v564_v56 = vpack.c.bf16 %v527_v50, %v523_v48 }
 0x3e8   :  { %v563_v57 = vpack.c.bf16 %v526_v53, %v522_v51  ;;  %v565_v58 = vpack.c.bf16 %v528_v54, %v524_v52  ;;  %v447_v59 = vpop.f32.mrb[16].mxu0  ;;  %v498_v60 = vpop.f32.mrb[16].mxu1 }
 0x3e9   :  { %v449_v61 = vpop.f32.mrb[17].mxu0  ;;  %v500_v62 = vpop.f32.mrb[17].mxu1  ;;  %v533_v11 = vadd.f32 %v531_v10, %v447_v59  ;;  %v535_v12 = vadd.f32 %v531_v10, %v498_v60  ;;  %v814_v59 = vmov 9  }
 0x3ea   :  { %573 = vmatprep.subr.bf16.mxu0 %v563_v57  ;;  %614 = vmatprep.subr.bf16.mxu1 %v565_v58  ;;  %v451_v63 = vpop.f32.mrb[18].mxu0  ;;  %v502_v4 = vpop.f32.mrb[18].mxu1  ;;  %v534_v14 = vadd.f32 %v531_v10, %v449_v61  ;;  %v536_v15 = vadd.f32 %v531_v10, %v500_v62  ;;  %v813_v58 = vmov 8  }
 0x3eb   :  { %574 = vmatpush1.bf16.msra.mxu0 %v562_v55  ;;  %615 = vmatpush1.bf16.msra.mxu1 %v564_v56  ;;  %v452_v6 = vpop.f32.mrb[19].mxu0  ;;  %v503_v8 = vpop.f32.mrb[19].mxu1  ;;  %v739_v16 = vmul.f32 -1.442695, %v533_v11  ;;  %v741_v20 = vmul.f32 -1.442695, %v535_v12 }
 0x3ec   :  { %v740_v21 = vmul.f32 -1.442695, %v534_v14  ;;  %v742_v22 = vmul.f32 -1.442695, %v536_v15  ;;  %763 = vset.pattern.permute.xlu1 %v813_v58  ;;  %764 = vset.pattern.permute.xlu0 %v814_v59 }
 0x3ed   :  { %787 = vpow2.f32 %v739_v16 }
 0x3ee   :  { %743 = vmatmul.mubr.msk.bf16.vlgmr.msra.gmra.mrb[20].mxu0 %vm234_vm2, %v561_v5  ;;  %744 = vmatmul.mubr.msk.bf16.vlgmr.msra.gmra.mrb[20].mxu1 %vm234_vm2, %v561_v5  ;;  %789 = vpow2.f32 %v741_v20 }
 0x3ef   :  { %791 = vpow2.f32 %v740_v21 }
 0x3f0   :  { %793 = vpow2.f32 %v742_v22 }
 0x3f7   :  { %v788_v23 = vpop.eup %787 }
 0x3f8   :  { %v790_v24 = vpop.eup %789  ;;  %v549_v27 = vadd.f32 1.0, %v788_v23 }
 0x3f9   :  { %v792_v25 = vpop.eup %791  ;;  %v551_v28 = vadd.f32 1.0, %v790_v24 }
 0x3fa   :  { %v794_v26 = vpop.eup %793  ;;  %v550_v29 = vadd.f32 1.0, %v792_v25  ;;  %795 = vrcp.f32 %v549_v27 }
 0x3fb   :  { %v552_v30 = vadd.f32 1.0, %v794_v26  ;;  %797 = vrcp.f32 %v551_v28 }
 0x3fc   :  { %799 = vrcp.f32 %v550_v29 }
 0x3fd   :  { %801 = vrcp.f32 %v552_v30 }
 0x404   :  { %v796_v31 = vpop.eup %795 }
 0x405   :  { %v798_v33 = vpop.eup %797 }
 0x406   :  { %v800_v34 = vpop.eup %799 }
 0x407   :  { %v802_v37 = vpop.eup %801 }
 0x4c1   :  { %v607_v35 = vpop.f32.mrb[20].mxu0  ;;  %v648_v36 = vpop.f32.mrb[20].mxu1 }
 0x4c2   :  { %v608_v38 = vadd.f32 %v607_v35, %v568_v32  ;;  %v649_v39 = vadd.f32 %v648_v36, %v568_v32  ;;  %v609_v40 = vpop.f32.mrb[21].mxu0  ;;  %v650_v3 = vpop.f32.mrb[21].mxu1 }
 0x4c3   :  { %v610_v41 = vadd.f32 %v609_v40, %v568_v32  ;;  %v651_v42 = vadd.f32 %v650_v3, %v568_v32  ;;  %v611_v43 = vpop.f32.mrb[22].mxu0  ;;  %v652_v44 = vpop.f32.mrb[22].mxu1 }
 0x4c4   :  { %v655_v45 = vmul.f32 %v796_v31, %v608_v38  ;;  %v657_v46 = vmul.f32 %v798_v33, %v649_v39  ;;  %v612_v47 = vpop.f32.mrb[23].mxu0  ;;  %v653_v48 = vpop.f32.mrb[23].mxu1 }
 0x4c5   :  { %v656_v49 = vmul.f32 %v800_v34, %v610_v41  ;;  %v658_v50 = vmul.f32 %v802_v37, %v651_v42 }
 0x4c6   :  { %v659_v51 = vadd.f32 %v655_v45, %v928_v17  ;;  %v661_v53 = vadd.f32 %v657_v46, %v932_v13 }
 0x4c7   :  { %v660_v52 = vadd.f32 %v656_v49, %v930_v18  ;;  %v662_v55 = vadd.f32 %v658_v50, %v934_v19 }
 0x4c9   :  { %v663_v54 = vadd.f32 %v660_v52, %v659_v51 }
 0x4cb   :  { %v664_v56 = vadd.f32 %v663_v54, %v661_v53 }
 0x4cd   :  { %v665_v57 = vadd.f32 %v664_v56, %v662_v55 }
 0x4cf   :  { %666 = vadd.xlane.f32.xlu1 %v665_v57 }
 0x4e0   :  { %690 = vperm.xlu1 %763, %v884_v9  }
 0x55c   :  { %v667_v60 = vpop.xlane.xlu1 %666 }
 0x55d   :  { %v668_v61 = vmul.f32 0.001953125, %v667_v60 }
 0x55f   :  { %v669_v62 = vsub.f32 %v659_v51, %v668_v61  ;;  %v670_v17 = vsub.f32 %v660_v52, %v668_v61  ;;  %v671_v63 = vsub.f32 %v661_v53, %v668_v61  ;;  %v672_v18 = vsub.f32 %v662_v55, %v668_v61 }
 0x560   :  { %v691_v16 = vpop.permute.xlu1 %690 }
 0x561   :  { %v673_v4 = vmul.f32 %v669_v62, %v669_v62  ;;  %v674_v13 = vmul.f32 %v670_v17, %v670_v17  ;;  %v675_v5 = vmul.f32 %v671_v63, %v671_v63  ;;  %v676_v19 = vmul.f32 %v672_v18, %v672_v18 }
 0x563   :  { %v677_v6 = vadd.f32 %v674_v13, %v673_v4 }
 0x565   :  { %v678_v8 = vadd.f32 %v677_v6, %v675_v5 }
 0x567   :  { %v679_v10 = vadd.f32 %v678_v8, %v676_v19 }
 0x569   :  { %680 = vadd.xlane.f32.xlu0 %v679_v10 }
 0x57f   :  { %698 = vperm.xlu0 %764, %v884_v9  }
 0x5f6   :  { %v681_v11 = vpop.xlane.xlu0 %680 }
 0x5f7   :  { %v682_v12 = vmul.f32 0.001953125, %v681_v11 }
 0x5f9   :  { %v683_v14 = vadd.f32 1e-05, %v682_v12 }
 0x5fb   :  { %803 = vrsqrt.f32 %v683_v14 }
 0x5fe   :  { %v699_v24 = vpop.permute.xlu0 %698 }
 0x605   :  { %v804_v15 = vpop.eup %803 }
 0x606   :  { %v685_v20 = vmul.f32 %v804_v15, %v669_v62  ;;  %v686_v21 = vmul.f32 %v804_v15, %v670_v17  ;;  %v687_v22 = vmul.f32 %v804_v15, %v671_v63  ;;  %v688_v23 = vmul.f32 %v804_v15, %v672_v18 }
 0x608   :  { %v693_v25 = vmul.f32 %v691_v16, %v685_v20  ;;  %v694_v26 = vmul.f32 %v691_v16, %v686_v21  ;;  %v695_v27 = vmul.f32 %v691_v16, %v687_v22  ;;  %v696_v28 = vmul.f32 %v691_v16, %v688_v23 }
 0x60a   :  { %v701_v29 = vadd.f32 %v699_v24, %v693_v25  ;;  %v702_v30 = vadd.f32 %v699_v24, %v694_v26  ;;  %v703_v31 = vadd.f32 %v699_v24, %v695_v27  ;;  %v704_v32 = vadd.f32 %v699_v24, %v696_v28 }
 0x60c   :  { %v705_v9 = vadd.f32 %v701_v29, %v863_v2  ;;  %v706_v33 = vadd.f32 %v702_v30, %v853_v0  ;;  %v707_v34 = vadd.f32 %v703_v31, %v876_v7  ;;  %v708_v35 = vadd.f32 %v704_v32, %v858_v1 }
 0x60e   :  { %709 = vst [vmem:[%s997_s6] sm:$0xff] %v705_v9  ;;  %710 = vst [vmem:[%s997_s6 + $0x8] sm:$0xff] %v706_v33 }
 0x60f   :  { %711 = vst [vmem:[%s997_s6 + $0x10] sm:$0xff] %v707_v34  ;;  %712 = vst [vmem:[%s997_s6 + $0x18] sm:$0xff] %v708_v35 }

</bundles_post_ra>
